<compile_context>
chip_gen: v7x
topology: tpu7x:2x2x1
jax: 0.10.0
libtpu: 0.0.40
codegen_flags: <defaults>
</compile_context>

<pallas_src>
import functools
import math

import jax
import jax.numpy as jnp
from jax.experimental import pallas as pl
from jax.experimental.pallas import tpu as pltpu


def _round_up(x, m):
    return (x + m - 1) // m * m


def _choose_tile_s(S, K, Z):
    """Pick a seq tile so that one pipeline stage of inputs stays ~2 MiB."""
    lane = 128
    # f32 VMEM bytes per event row across all input blocks (lane-padded).
    row_bytes = 4 * (_round_up(max(K, 1), lane)
                     + 2 * _round_up(max(Z, 1), lane)
                     + 3 * lane)
    budget = 2 * 1024 * 1024            # x2 double-buffering stays << 32 MiB
    max_tile = max(8, min((budget // row_bytes) // 8 * 8, 2048))
    s8 = _round_up(S, 8)
    n_tiles = -(-s8 // max_tile)        # cdiv
    tile = _round_up(-(-s8 // n_tiles), 8)
    return int(tile)


# ----------------------------------------------------------------------------
# Pallas kernel.
#   grid = (B, S_pad // TILE_S)
#   scalar-prefetch: seq_len (B,) int32 in SMEM
#   inputs : intensity (1,2) f32, time_logits/time_target/mark_target
#            (B, S_pad, 1), mark_logits (B, S_pad, K), mu/logvar (B, S_pad, Z)
#   outputs: three (1,1) f32 scalars (neg time LL, mark NLL, KLD)
#   scratch: four (1,1) f32 VMEM accumulators
# ----------------------------------------------------------------------------
def vaetpp_loss_kernel(seqlen_ref, intens_ref,
                       tl_ref, td_ref, mt_ref, ml_ref, mu_ref, lv_ref,
                       time_out_ref, mark_out_ref, kld_out_ref,
                       acc_time, acc_mark, acc_kld, acc_mask,
                       *, ignore_index, clamp_max=10.0):
    b = pl.program_id(0)
    j = pl.program_id(1)
    first = jnp.logical_and(b == 0, j == 0)
    last = jnp.logical_and(b == pl.num_programs(0) - 1,
                           j == pl.num_programs(1) - 1)

    @pl.when(first)
    def _init():
        acc_time[...] = jnp.zeros_like(acc_time)
        acc_mark[...] = jnp.zeros_like(acc_mark)
        acc_kld[...] = jnp.zeros_like(acc_kld)
        acc_mask[...] = jnp.zeros_like(acc_mask)

    tile_s = tl_ref.shape[1]
    k_dim = ml_ref.shape[2]

    # Sequence mask for this (batch, seq-tile), rebuilt from iota + SMEM scalar.
    sl = seqlen_ref[b]
    pos = j * tile_s + jax.lax.broadcasted_iota(jnp.int32, (tile_s, 1), 0)
    mask_b = pos < sl                                   # (tile_s, 1) bool
    mask_f = mask_b.astype(jnp.float32)

    iv = intens_ref[...].astype(jnp.float32)            # (1, 2)
    iw = iv[:, 0:1]                                     # (1, 1)
    ib = iv[:, 1:2]                                     # (1, 1)
    inv_w = 1.0 / iw

    # ---- TPP time log-likelihood ------------------------------------------
    tl = tl_ref[0].astype(jnp.float32)                  # (tile_s, 1)
    td = td_ref[0].astype(jnp.float32)
    a = tl + iw * td + ib
    c = tl + ib
    integral = (jnp.exp(jnp.minimum(a, clamp_max))
                - jnp.exp(jnp.minimum(c, clamp_max))) * inv_w
    time_ll = jnp.where(mask_b, a - integral, 0.0)      # NaN-safe masking
    acc_time[...] += jnp.sum(time_ll, axis=0, keepdims=True)

    # ---- mark NLL: -log_prob[target]; 0 if masked or target == ignore_index
    ml = ml_ref[0].astype(jnp.float32)                  # (tile_s, K)
    mt = mt_ref[0]                                      # (tile_s, 1) int32
    valid = jnp.logical_and(mask_b, mt != ignore_index)
    kiota = jax.lax.broadcasted_iota(jnp.int32, (tile_s, k_dim), 1)
    picked = jnp.where(jnp.logical_and(kiota == mt, valid), ml, 0.0)
    picked_row = jnp.sum(picked, axis=1, keepdims=True)  # (tile_s, 1)
    acc_mark[...] += -jnp.sum(picked_row, axis=0, keepdims=True)

    # ---- KL divergence ------------------------------------------------------
    mu = mu_ref[0].astype(jnp.float32)                  # (tile_s, Z)
    lv = lv_ref[0].astype(jnp.float32)
    inner = jnp.sum(1.0 + lv - mu * mu - jnp.exp(lv), axis=1, keepdims=True)
    kld_row = jnp.where(mask_b, -0.5 * inner, 0.0)
    acc_kld[...] += jnp.sum(kld_row, axis=0, keepdims=True)

    # ---- mask sum -----------------------------------------------------------
    acc_mask[...] += jnp.sum(mask_f, axis=0, keepdims=True)

    @pl.when(last)
    def _finalize():
        denom = jnp.maximum(acc_mask[...], 1.0)         # guard empty batch
        inv = 1.0 / denom
        time_out_ref[...] = -acc_time[...] * inv
        mark_out_ref[...] = acc_mark[...] * inv
        kld_out_ref[...] = acc_kld[...] * inv


def vaetpp_loss_pallas(time_logits_sq, mark_logits, mu, logvar,
                       time_target, mark_target, seq_len,
                       intensity_w, intensity_b, ignore_index=-100):
    """Returns (neg_time_loglik, mark_loss, kld) as (1, 1) f32 arrays."""
    B, S = time_logits_sq.shape
    K = mark_logits.shape[-1]
    Z = mu.shape[-1]

    tile_s = _choose_tile_s(S, K, Z)
    s_pad = _round_up(S, tile_s)

    def pad_s(x):
        if s_pad == S:
            return x
        pads = [(0, 0)] * x.ndim
        pads[1] = (0, s_pad - S)
        return jnp.pad(x, pads)

    # Keep native dtypes (bf16 stays bf16 through HBM); cast happens in-kernel.
    tl3 = pad_s(time_logits_sq)[..., None]              # (B, S_pad, 1)
    td3 = pad_s(time_target)[..., None]
    mt3 = pad_s(mark_target.astype(jnp.int32))[..., None]
    ml3 = pad_s(mark_logits)                            # (B, S_pad, K)
    mu3 = pad_s(mu)                                     # (B, S_pad, Z)
    lv3 = pad_s(logvar)

    intens = jnp.stack([jnp.asarray(intensity_w, jnp.float32),
                        jnp.asarray(intensity_b, jnp.float32)]).reshape(1, 2)
    seqlen = jnp.asarray(seq_len, jnp.int32).reshape(B)

    grid = (B, s_pad // tile_s)

    ev_spec = pl.BlockSpec((1, tile_s, 1), lambda b, j, *_: (b, j, 0))
    scalar_out_spec = pl.BlockSpec((1, 1), lambda b, j, *_: (0, 0))

    kernel = functools.partial(vaetpp_loss_kernel,
                               ignore_index=int(ignore_index))

    in_bytes = sum(int(x.size) * x.dtype.itemsize
                   for x in (tl3, td3, mt3, ml3, mu3, lv3))
    cost = pl.CostEstimate(
        flops=int(B) * int(s_pad) * (2 * K + 4 * Z + 16),
        transcendentals=int(B) * int(s_pad) * (Z + 2),
        bytes_accessed=in_bytes + 64)

    out = pl.pallas_call(
        kernel,
        grid_spec=pltpu.PrefetchScalarGridSpec(
            num_scalar_prefetch=1,
            grid=grid,
            in_specs=[
                pl.BlockSpec((1, 2), lambda b, j, *_: (0, 0)),      # intensity
                ev_spec,                                            # time logits
                ev_spec,                                            # time target
                ev_spec,                                            # mark target
                pl.BlockSpec((1, tile_s, K), lambda b, j, *_: (b, j, 0)),
                pl.BlockSpec((1, tile_s, Z), lambda b, j, *_: (b, j, 0)),
                pl.BlockSpec((1, tile_s, Z), lambda b, j, *_: (b, j, 0)),
            ],
            out_specs=(scalar_out_spec, scalar_out_spec, scalar_out_spec),
            scratch_shapes=[pltpu.VMEM((1, 1), jnp.float32)] * 4,
        ),
        out_shape=(jax.ShapeDtypeStruct((1, 1), jnp.float32),
                   jax.ShapeDtypeStruct((1, 1), jnp.float32),
                   jax.ShapeDtypeStruct((1, 1), jnp.float32)),
        compiler_params=pltpu.CompilerParams(
            dimension_semantics=("arbitrary", "arbitrary"),
            vmem_limit_bytes=32 * 1024 * 1024),
        cost_estimate=cost,
    )(seqlen, intens, tl3, td3, mt3, ml3, mu3, lv3)
    return out


# ----------------------------------------------------------------------------
# Plain-JAX glue: decoder init/forward, regularization, beta schedule, combine.
# ----------------------------------------------------------------------------
def init_decoder_params(key, n_in, n_hid, z_dim, num_event_types):
    ks = jax.random.split(key, 12)

    def lin(kw, kb, out_d, in_d):
        bound = 1.0 / math.sqrt(in_d)
        w = jax.random.uniform(kw, (out_d, in_d), jnp.float32, -bound, bound)
        b = jax.random.uniform(kb, (out_d,), jnp.float32, -bound, bound)
        return w, b

    p = {}
    p["fc1_w"], p["fc1_b"] = lin(ks[0], ks[1], n_hid, n_in)
    p["fc21_w"], p["fc21_b"] = lin(ks[2], ks[3], z_dim, n_hid)
    p["fc22_w"], p["fc22_b"] = lin(ks[4], ks[5], z_dim, n_hid)
    p["fc3_w"], p["fc3_b"] = lin(ks[6], ks[7], n_hid, z_dim)
    p["fc4_time_w"], p["fc4_time_b"] = lin(ks[8], ks[9], 1, n_hid)
    p["fc4_mark_w"], p["fc4_mark_b"] = lin(ks[10], ks[11], num_event_types, n_hid)
    p["intensity_w"] = jnp.float32(0.1)
    p["intensity_b"] = jnp.float32(0.1)
    return p


def decoder_forward(params, hidden_states, eps_key, eps=1e-8):
    silu = lambda x: x * jax.nn.sigmoid(x)
    h1 = silu(hidden_states @ params["fc1_w"].T + params["fc1_b"])
    mu = h1 @ params["fc21_w"].T + params["fc21_b"]
    logvar = jax.nn.softplus(h1 @ params["fc22_w"].T + params["fc22_b"]) + eps
    std = jnp.exp(0.5 * logvar)
    z = mu + jax.random.normal(eps_key, std.shape, std.dtype) * std
    h3 = jax.nn.sigmoid(z @ params["fc3_w"].T + params["fc3_b"])
    time_logits = h3 @ params["fc4_time_w"].T + params["fc4_time_b"]      # (B,S,1)
    mark_logits = h3 @ params["fc4_mark_w"].T + params["fc4_mark_b"]      # (B,S,K)
    mark_logits = jax.nn.log_softmax(mark_logits, axis=-1)
    return time_logits, mark_logits, mu, logvar


def cosine_beta_schedule(step, n_steps, beta_start, beta_end, warmup_steps):
    if step <= warmup_steps:
        return beta_start
    cycle_step = (step - warmup_steps) % n_steps
    progress = cycle_step / n_steps
    return beta_end + 0.5 * (beta_start - beta_end) * (1 + math.cos(progress * math.pi))


def vaetpp_loss_forward(params, decoder_output, time_target, mark_target,
                        sequence_length, *, current_step=0, beta_start=0.0,
                        beta_end=1.0, n_steps=1000, warmup_steps=1000,
                        l1_lambda=0.0, l2_lambda=0.0, ignore_index=-100):
    time_logits, mark_logits, _base_intensity, mu, logvar = decoder_output
    time_logits_sq = jnp.squeeze(time_logits, axis=-1)   # (B, S)

    time_loss, mark_loss, kld = vaetpp_loss_pallas(
        time_logits_sq, mark_logits, mu, logvar,
        time_target, mark_target, sequence_length,
        params["intensity_w"], params["intensity_b"], ignore_index)
    time_loss = time_loss[0, 0]
    mark_loss = mark_loss[0, 0]
    kld = kld[0, 0]

    # L1 / L2 regularization over decoder parameters (matches torch.norm(p,1/2)).
    l1 = sum(jnp.sum(jnp.abs(p)) for p in params.values())
    l2 = sum(jnp.sqrt(jnp.sum(jnp.square(p))) for p in params.values())
    l1_reg = l1_lambda * l1
    l2_reg = l2_lambda * l2

    recon = time_loss + mark_loss + l1_reg + l2_reg
    beta = cosine_beta_schedule(current_step, n_steps, beta_start, beta_end,
                                warmup_steps)
    elbo = recon + beta * kld
    return time_loss, mark_loss, elbo, kld


def _reference_losses(time_logits_sq, mark_logits, mu, logvar, time_target,
                      mark_target, seq_len, iw, ib, ignore_index=-100):
    """Pure-JAX reference matching the PyTorch module (for self-check)."""
    B, S = time_logits_sq.shape
    mask = (jnp.arange(S)[None, :] < seq_len[:, None]).astype(jnp.float32)
    a = time_logits_sq + iw * time_target + ib
    c = time_logits_sq + ib
    integral = (jnp.exp(jnp.minimum(a, 10.0)) - jnp.exp(jnp.minimum(c, 10.0))) / iw
    neg_time = -jnp.sum((a - integral) * mask) / jnp.sum(mask)
    safe_t = jnp.maximum(mark_target, 0)
    nll = -jnp.take_along_axis(mark_logits, safe_t[..., None], axis=-1)[..., 0]
    nll = jnp.where(mark_target == ignore_index, 0.0, nll)
    mark_loss = jnp.sum(nll * mask) / jnp.sum(mask)
    kld = -0.5 * jnp.sum(1.0 + logvar - mu * mu - jnp.exp(logvar), axis=-1)
    kld_loss = jnp.sum(kld * mask) / jnp.sum(mask)
    return neg_time, mark_loss, kld_loss


if __name__ == "__main__":
    # Small shapes consistent with the module.
    B, S = 2, 8              # batch, sequence length
    n_in, n_hid, z_dim, K = 32, 32, 16, 8

    key = jax.random.PRNGKey(0)
    k_params, k_hidden, k_eps, k_td, k_mt = jax.random.split(key, 5)

    params = init_decoder_params(k_params, n_in, n_hid, z_dim, K)

    hidden_states = jax.random.normal(k_hidden, (B, S, n_in), jnp.float32)
    time_logits, mark_logits, mu, logvar = decoder_forward(params, hidden_states, k_eps)
    decoder_output = (time_logits, mark_logits, params["intensity_b"], mu, logvar)

    time_target = jax.random.uniform(k_td, (B, S), jnp.float32, 0.0, 2.0)
    mark_target = jax.random.randint(k_mt, (B, S), 0, K, jnp.int32)
    mark_target = mark_target.at[0, 2].set(-100)        # exercise ignore_index
    sequence_length = jnp.array([S, S - 3], dtype=jnp.int32)

    time_loss, mark_loss, elbo, kld = vaetpp_loss_forward(
        params, decoder_output, time_target, mark_target, sequence_length)
    jax.block_until_ready((time_loss, mark_loss, elbo))

    # Self-check against a plain-JAX reference of the loss math.
    rt, rm, rk = _reference_losses(
        jnp.squeeze(time_logits, -1), mark_logits, mu, logvar,
        time_target, mark_target, sequence_length,
        params["intensity_w"], params["intensity_b"])
    ok = (bool(jnp.allclose(time_loss, rt, rtol=1e-4, atol=1e-4))
          and bool(jnp.allclose(mark_loss, rm, rtol=1e-4, atol=1e-4))
          and bool(jnp.allclose(kld, rk, rtol=1e-4, atol=1e-4)))
    if not ok:
        raise SystemExit(
            f"mismatch: kernel=({float(time_loss)}, {float(mark_loss)}, {float(kld)}) "
            f"ref=({float(rt)}, {float(rm)}, {float(rk)})")
    print("KERNEL_OK")
</pallas_src>

<mosaic_0001>
module attributes {stable_mosaic.version = 11 : i64} {
  func.func @vaetpp_loss_kernel(%arg0: i32, %arg1: i32, %arg2: memref<2xi32, #tpu.memory_space<smem>>, %arg3: memref<1x2xf32, #tpu.memory_space<vmem>>, %arg4: memref<1x8x1xf32, #tpu.memory_space<vmem>>, %arg5: memref<1x8x1xf32, #tpu.memory_space<vmem>>, %arg6: memref<1x8x1xi32, #tpu.memory_space<vmem>>, %arg7: memref<1x8x8xf32, #tpu.memory_space<vmem>>, %arg8: memref<1x8x16xf32, #tpu.memory_space<vmem>>, %arg9: memref<1x8x16xf32, #tpu.memory_space<vmem>>, %arg10: memref<1x1xf32, #tpu.memory_space<vmem>>, %arg11: memref<1x1xf32, #tpu.memory_space<vmem>>, %arg12: memref<1x1xf32, #tpu.memory_space<vmem>>, %arg13: memref<1x1xf32, #tpu.memory_space<vmem>>, %arg14: memref<1x1xf32, #tpu.memory_space<vmem>>, %arg15: memref<1x1xf32, #tpu.memory_space<vmem>>, %arg16: memref<1x1xf32, #tpu.memory_space<vmem>>) attributes {dimension_semantics = [#tpu.dimension_semantics<arbitrary>, #tpu.dimension_semantics<arbitrary>], iteration_bounds = array<i64: 2, 1>, scalar_prefetch = 1 : i64, scratch_operands = 4 : i64, tpu.core_type = #tpu.core_type<tc>, window_params = [{pipeline_mode = #tpu.pipeline_mode<synchronous>, transform_indices = @transform_0, window_bounds = array<i64: 1, 2>}, {transform_indices = @transform_1, window_bounds = array<i64: 1, 8, 1>}, {transform_indices = @transform_2, window_bounds = array<i64: 1, 8, 1>}, {transform_indices = @transform_3, window_bounds = array<i64: 1, 8, 1>}, {transform_indices = @transform_4, window_bounds = array<i64: 1, 8, 8>}, {transform_indices = @transform_5, window_bounds = array<i64: 1, 8, 16>}, {transform_indices = @transform_6, window_bounds = array<i64: 1, 8, 16>}, {pipeline_mode = #tpu.pipeline_mode<synchronous>, transform_indices = @transform_7, window_bounds = array<i64: 1, 1>}, {pipeline_mode = #tpu.pipeline_mode<synchronous>, transform_indices = @transform_8, window_bounds = array<i64: 1, 1>}, {pipeline_mode = #tpu.pipeline_mode<synchronous>, transform_indices = @transform_9, window_bounds = array<i64: 1, 1>}]} {
    %c0_i32 = arith.constant 0 : i32
    %0 = arith.cmpi eq, %arg0, %c0_i32 : i32
    %c0_i32_0 = arith.constant 0 : i32
    %1 = arith.cmpi eq, %arg1, %c0_i32_0 : i32
    %2 = arith.andi %0, %1 : i1
    %c1_i32 = arith.constant 1 : i32
    %3 = arith.cmpi eq, %arg0, %c1_i32 : i32
    %c0_i32_1 = arith.constant 0 : i32
    %4 = arith.cmpi eq, %arg1, %c0_i32_1 : i32
    %5 = arith.andi %3, %4 : i1
    %6 = arith.extui %2 : i1 to i32
    %c0_i32_2 = arith.constant 0 : i32
    %7 = arith.cmpi ne, %6, %c0_i32_2 : i32
    scf.if %7 {
      %cst_53 = arith.constant 0.000000e+00 : f32
      %102 = vector.broadcast %cst_53 : f32 to vector<1x1xf32>
      %c0_54 = arith.constant 0 : index
      %c0_55 = arith.constant 0 : index
      %103 = vector.load %arg13[%c0_54, %c0_55] : memref<1x1xf32, #tpu.memory_space<vmem>>, vector<1x1xf32>
      tpu.vector_store %arg13[%c0_54, %c0_55], %102 {strides = array<i32>} : memref<1x1xf32, #tpu.memory_space<vmem>>, vector<1x1xf32>,
      %cst_56 = arith.constant 0.000000e+00 : f32
      %104 = vector.broadcast %cst_56 : f32 to vector<1x1xf32>
      %c0_57 = arith.constant 0 : index
      %c0_58 = arith.constant 0 : index
      %105 = vector.load %arg14[%c0_57, %c0_58] : memref<1x1xf32, #tpu.memory_space<vmem>>, vector<1x1xf32>
      tpu.vector_store %arg14[%c0_57, %c0_58], %104 {strides = array<i32>} : memref<1x1xf32, #tpu.memory_space<vmem>>, vector<1x1xf32>,
      %cst_59 = arith.constant 0.000000e+00 : f32
      %106 = vector.broadcast %cst_59 : f32 to vector<1x1xf32>
      %c0_60 = arith.constant 0 : index
      %c0_61 = arith.constant 0 : index
      %107 = vector.load %arg15[%c0_60, %c0_61] : memref<1x1xf32, #tpu.memory_space<vmem>>, vector<1x1xf32>
      tpu.vector_store %arg15[%c0_60, %c0_61], %106 {strides = array<i32>} : memref<1x1xf32, #tpu.memory_space<vmem>>, vector<1x1xf32>,
      %cst_62 = arith.constant 0.000000e+00 : f32
      %108 = vector.broadcast %cst_62 : f32 to vector<1x1xf32>
      %c0_63 = arith.constant 0 : index
      %c0_64 = arith.constant 0 : index
      %109 = vector.load %arg16[%c0_63, %c0_64] : memref<1x1xf32, #tpu.memory_space<vmem>>, vector<1x1xf32>
      tpu.vector_store %arg16[%c0_63, %c0_64], %108 {strides = array<i32>} : memref<1x1xf32, #tpu.memory_space<vmem>>, vector<1x1xf32>,
    } else {
    }
    %8 = arith.index_cast %arg0 : i32 to index
    %9 = memref.load %arg2[%8] : memref<2xi32, #tpu.memory_space<smem>>
    %c8_i32 = arith.constant 8 : i32
    %10 = arith.muli %arg1, %c8_i32 : i32
    %11 = tpu.iota {dimensions = array<i32: 0>} : vector<8x1xi32>
    %12 = vector.broadcast %10 : i32 to vector<8x1xi32>
    %13 = arith.addi %12, %11 : vector<8x1xi32>
    %14 = vector.broadcast %9 : i32 to vector<8x1xi32>
    %15 = arith.cmpi slt, %13, %14 : vector<8x1xi32>
    %16 = arith.extui %15 : vector<8x1xi1> to vector<8x1xi32>
    %17 = arith.sitofp %16 : vector<8x1xi32> to vector<8x1xf32>
    %c0 = arith.constant 0 : index
    %c0_3 = arith.constant 0 : index
    %18 = vector.load %arg3[%c0, %c0_3] : memref<1x2xf32, #tpu.memory_space<vmem>>, vector<1x2xf32>
    %19 = vector.extract_strided_slice %18 {offsets = [0, 0], sizes = [1, 1], strides = [1, 1]} : vector<1x2xf32> to vector<1x1xf32>
    %20 = vector.extract_strided_slice %18 {offsets = [0, 1], sizes = [1, 1], strides = [1, 1]} : vector<1x2xf32> to vector<1x1xf32>
    %cst = arith.constant 1.000000e+00 : f32
    %21 = vector.broadcast %cst : f32 to vector<1x1xf32>
    %22 = arith.divf %21, %19 : vector<1x1xf32>
    %c0_4 = arith.constant 0 : index
    %c0_5 = arith.constant 0 : index
    %c0_6 = arith.constant 0 : index
    %23 = vector.load %arg4[%c0_4, %c0_5, %c0_6] : memref<1x8x1xf32, #tpu.memory_space<vmem>>, vector<1x8x1xf32>
    %24 = vector.shape_cast %23 : vector<1x8x1xf32> to vector<8x1xf32>
    %c0_7 = arith.constant 0 : index
    %c0_8 = arith.constant 0 : index
    %c0_9 = arith.constant 0 : index
    %25 = vector.load %arg5[%c0_7, %c0_8, %c0_9] : memref<1x8x1xf32, #tpu.memory_space<vmem>>, vector<1x8x1xf32>
    %26 = vector.shape_cast %25 : vector<1x8x1xf32> to vector<8x1xf32>
    %27 = vector.broadcast %19 : vector<1x1xf32> to vector<8x1xf32>
    %28 = arith.mulf %27, %26 : vector<8x1xf32>
    %29 = arith.addf %24, %28 : vector<8x1xf32>
    %30 = vector.broadcast %20 : vector<1x1xf32> to vector<8x1xf32>
    %31 = arith.addf %29, %30 : vector<8x1xf32>
    %32 = vector.broadcast %20 : vector<1x1xf32> to vector<8x1xf32>
    %33 = arith.addf %24, %32 : vector<8x1xf32>
    %cst_10 = arith.constant 1.000000e+01 : f32
    %34 = vector.broadcast %cst_10 : f32 to vector<8x1xf32>
    %35 = arith.minimumf %31, %34 : vector<8x1xf32>
    %36 = math.exp %35 : vector<8x1xf32>
    %cst_11 = arith.constant 1.000000e+01 : f32
    %37 = vector.broadcast %cst_11 : f32 to vector<8x1xf32>
    %38 = arith.minimumf %33, %37 : vector<8x1xf32>
    %39 = math.exp %38 : vector<8x1xf32>
    %40 = arith.subf %36, %39 : vector<8x1xf32>
    %41 = vector.broadcast %22 : vector<1x1xf32> to vector<8x1xf32>
    %42 = arith.mulf %40, %41 : vector<8x1xf32>
    %43 = arith.subf %31, %42 : vector<8x1xf32>
    %cst_12 = arith.constant 0.000000e+00 : f32
    %44 = vector.broadcast %cst_12 : f32 to vector<8x1xf32>
    %45 = arith.select %15, %43, %44 : vector<8x1xi1>, vector<8x1xf32>
    %c0_13 = arith.constant 0 : index
    %c0_14 = arith.constant 0 : index
    %46 = vector.load %arg13[%c0_13, %c0_14] : memref<1x1xf32, #tpu.memory_space<vmem>>, vector<1x1xf32>
    %cst_15 = arith.constant dense<0.000000e+00> : vector<1xf32>
    %47 = vector.multi_reduction <add>, %45, %cst_15 [0] : vector<8x1xf32> to vector<1xf32>
    %48 = vector.shape_cast %47 : vector<1xf32> to vector<1x1xf32>
    %49 = arith.addf %46, %48 : vector<1x1xf32>
    %c0_16 = arith.constant 0 : index
    %c0_17 = arith.constant 0 : index
    %50 = vector.load %arg13[%c0_16, %c0_17] : memref<1x1xf32, #tpu.memory_space<vmem>>, vector<1x1xf32>
    tpu.vector_store %arg13[%c0_16, %c0_17], %49 {strides = array<i32>} : memref<1x1xf32, #tpu.memory_space<vmem>>, vector<1x1xf32>,
    %c0_18 = arith.constant 0 : index
    %c0_19 = arith.constant 0 : index
    %c0_20 = arith.constant 0 : index
    %51 = vector.load %arg7[%c0_18, %c0_19, %c0_20] : memref<1x8x8xf32, #tpu.memory_space<vmem>>, vector<1x8x8xf32>
    %52 = vector.shape_cast %51 : vector<1x8x8xf32> to vector<8x8xf32>
    %c0_21 = arith.constant 0 : index
    %c0_22 = arith.constant 0 : index
    %c0_23 = arith.constant 0 : index
    %53 = vector.load %arg6[%c0_21, %c0_22, %c0_23] : memref<1x8x1xi32, #tpu.memory_space<vmem>>, vector<1x8x1xi32>
    %54 = vector.shape_cast %53 : vector<1x8x1xi32> to vector<8x1xi32>
    %c-100_i32 = arith.constant -100 : i32
    %55 = vector.broadcast %c-100_i32 : i32 to vector<8x1xi32>
    %56 = arith.cmpi ne, %54, %55 : vector<8x1xi32>
    %57 = arith.andi %15, %56 : vector<8x1xi1>
    %58 = tpu.iota {dimensions = array<i32: 1>} : vector<8x8xi32>
    %59 = vector.broadcast %54 : vector<8x1xi32> to vector<8x8xi32>
    %60 = arith.cmpi eq, %58, %59 : vector<8x8xi32>
    %61 = vector.broadcast %57 : vector<8x1xi1> to vector<8x8xi1>
    %62 = arith.andi %60, %61 : vector<8x8xi1>
    %cst_24 = arith.constant 0.000000e+00 : f32
    %63 = vector.broadcast %cst_24 : f32 to vector<8x8xf32>
    %64 = arith.select %62, %52, %63 : vector<8x8xi1>, vector<8x8xf32>
    %cst_25 = arith.constant dense<0.000000e+00> : vector<8xf32>
    %65 = vector.multi_reduction <add>, %64, %cst_25 [1] : vector<8x8xf32> to vector<8xf32>
    %66 = vector.shape_cast %65 : vector<8xf32> to vector<8x1xf32>
    %c0_26 = arith.constant 0 : index
    %c0_27 = arith.constant 0 : index
    %67 = vector.load %arg14[%c0_26, %c0_27] : memref<1x1xf32, #tpu.memory_space<vmem>>, vector<1x1xf32>
    %cst_28 = arith.constant dense<0.000000e+00> : vector<1xf32>
    %68 = vector.multi_reduction <add>, %66, %cst_28 [0] : vector<8x1xf32> to vector<1xf32>
    %69 = vector.shape_cast %68 : vector<1xf32> to vector<1x1xf32>
    %cst_29 = arith.constant 0.000000e+00 : f32
    %70 = vector.broadcast %cst_29 : f32 to vector<1x1xf32>
    %71 = arith.subf %70, %69 : vector<1x1xf32>
    %72 = arith.addf %67, %71 : vector<1x1xf32>
    %c0_30 = arith.constant 0 : index
    %c0_31 = arith.constant 0 : index
    %73 = vector.load %arg14[%c0_30, %c0_31] : memref<1x1xf32, #tpu.memory_space<vmem>>, vector<1x1xf32>
    tpu.vector_store %arg14[%c0_30, %c0_31], %72 {strides = array<i32>} : memref<1x1xf32, #tpu.memory_space<vmem>>, vector<1x1xf32>,
    %c0_32 = arith.constant 0 : index
    %c0_33 = arith.constant 0 : index
    %c0_34 = arith.constant 0 : index
    %74 = vector.load %arg8[%c0_32, %c0_33, %c0_34] : memref<1x8x16xf32, #tpu.memory_space<vmem>>, vector<1x8x16xf32>
    %75 = vector.shape_cast %74 : vector<1x8x16xf32> to vector<8x16xf32>
    %c0_35 = arith.constant 0 : index
    %c0_36 = arith.constant 0 : index
    %c0_37 = arith.constant 0 : index
    %76 = vector.load %arg9[%c0_35, %c0_36, %c0_37] : memref<1x8x16xf32, #tpu.memory_space<vmem>>, vector<1x8x16xf32>
    %77 = vector.shape_cast %76 : vector<1x8x16xf32> to vector<8x16xf32>
    %cst_38 = arith.constant 1.000000e+00 : f32
    %78 = vector.broadcast %cst_38 : f32 to vector<8x16xf32>
    %79 = arith.addf %78, %77 : vector<8x16xf32>
    %80 = arith.mulf %75, %75 : vector<8x16xf32>
    %81 = arith.subf %79, %80 : vector<8x16xf32>
    %82 = math.exp %77 : vector<8x16xf32>
    %83 = arith.subf %81, %82 : vector<8x16xf32>
    %cst_39 = arith.constant dense<0.000000e+00> : vector<8xf32>
    %84 = vector.multi_reduction <add>, %83, %cst_39 [1] : vector<8x16xf32> to vector<8xf32>
    %85 = vector.shape_cast %84 : vector<8xf32> to vector<8x1xf32>
    %cst_40 = arith.constant -5.000000e-01 : f32
    %86 = vector.broadcast %cst_40 : f32 to vector<8x1xf32>
    %87 = arith.mulf %86, %85 : vector<8x1xf32>
    %cst_41 = arith.constant 0.000000e+00 : f32
    %88 = vector.broadcast %cst_41 : f32 to vector<8x1xf32>
    %89 = arith.select %15, %87, %88 : vector<8x1xi1>, vector<8x1xf32>
    %c0_42 = arith.constant 0 : index
    %c0_43 = arith.constant 0 : index
    %90 = vector.load %arg15[%c0_42, %c0_43] : memref<1x1xf32, #tpu.memory_space<vmem>>, vector<1x1xf32>
    %cst_44 = arith.constant dense<0.000000e+00> : vector<1xf32>
    %91 = vector.multi_reduction <add>, %89, %cst_44 [0] : vector<8x1xf32> to vector<1xf32>
    %92 = vector.shape_cast %91 : vector<1xf32> to vector<1x1xf32>
    %93 = arith.addf %90, %92 : vector<1x1xf32>
    %c0_45 = arith.constant 0 : index
    %c0_46 = arith.constant 0 : index
    %94 = vector.load %arg15[%c0_45, %c0_46] : memref<1x1xf32, #tpu.memory_space<vmem>>, vector<1x1xf32>
    tpu.vector_store %arg15[%c0_45, %c0_46], %93 {strides = array<i32>} : memref<1x1xf32, #tpu.memory_space<vmem>>, vector<1x1xf32>,
    %c0_47 = arith.constant 0 : index
    %c0_48 = arith.constant 0 : index
    %95 = vector.load %arg16[%c0_47, %c0_48] : memref<1x1xf32, #tpu.memory_space<vmem>>, vector<1x1xf32>
    %cst_49 = arith.constant dense<0.000000e+00> : vector<1xf32>
    %96 = vector.multi_reduction <add>, %17, %cst_49 [0] : vector<8x1xf32> to vector<1xf32>
    %97 = vector.shape_cast %96 : vector<1xf32> to vector<1x1xf32>
    %98 = arith.addf %95, %97 : vector<1x1xf32>
    %c0_50 = arith.constant 0 : index
    %c0_51 = arith.constant 0 : index
    %99 = vector.load %arg16[%c0_50, %c0_51] : memref<1x1xf32, #tpu.memory_space<vmem>>, vector<1x1xf32>
    tpu.vector_store %arg16[%c0_50, %c0_51], %98 {strides = array<i32>} : memref<1x1xf32, #tpu.memory_space<vmem>>, vector<1x1xf32>,
    %100 = arith.extui %5 : i1 to i32
    %c0_i32_52 = arith.constant 0 : i32
    %101 = arith.cmpi ne, %100, %c0_i32_52 : i32
    scf.if %101 {
      %c0_53 = arith.constant 0 : index
      %c0_54 = arith.constant 0 : index
      %102 = vector.load %arg16[%c0_53, %c0_54] : memref<1x1xf32, #tpu.memory_space<vmem>>, vector<1x1xf32>
      %cst_55 = arith.constant 1.000000e+00 : f32
      %103 = vector.broadcast %cst_55 : f32 to vector<1x1xf32>
      %104 = arith.maximumf %102, %103 : vector<1x1xf32>
      %cst_56 = arith.constant 1.000000e+00 : f32
      %105 = vector.broadcast %cst_56 : f32 to vector<1x1xf32>
      %106 = arith.divf %105, %104 : vector<1x1xf32>
      %c0_57 = arith.constant 0 : index
      %c0_58 = arith.constant 0 : index
      %107 = vector.load %arg13[%c0_57, %c0_58] : memref<1x1xf32, #tpu.memory_space<vmem>>, vector<1x1xf32>
      %cst_59 = arith.constant 0.000000e+00 : f32
      %108 = vector.broadcast %cst_59 : f32 to vector<1x1xf32>
      %109 = arith.subf %108, %107 : vector<1x1xf32>
      %110 = arith.mulf %109, %106 : vector<1x1xf32>
      %c0_60 = arith.constant 0 : index
      %c0_61 = arith.constant 0 : index
      %111 = vector.load %arg10[%c0_60, %c0_61] : memref<1x1xf32, #tpu.memory_space<vmem>>, vector<1x1xf32>
      tpu.vector_store %arg10[%c0_60, %c0_61], %110 {strides = array<i32>} : memref<1x1xf32, #tpu.memory_space<vmem>>, vector<1x1xf32>,
      %c0_62 = arith.constant 0 : index
      %c0_63 = arith.constant 0 : index
      %112 = vector.load %arg14[%c0_62, %c0_63] : memref<1x1xf32, #tpu.memory_space<vmem>>, vector<1x1xf32>
      %113 = arith.mulf %112, %106 : vector<1x1xf32>
      %c0_64 = arith.constant 0 : index
      %c0_65 = arith.constant 0 : index
      %114 = vector.load %arg11[%c0_64, %c0_65] : memref<1x1xf32, #tpu.memory_space<vmem>>, vector<1x1xf32>
      tpu.vector_store %arg11[%c0_64, %c0_65], %113 {strides = array<i32>} : memref<1x1xf32, #tpu.memory_space<vmem>>, vector<1x1xf32>,
      %c0_66 = arith.constant 0 : index
      %c0_67 = arith.constant 0 : index
      %115 = vector.load %arg15[%c0_66, %c0_67] : memref<1x1xf32, #tpu.memory_space<vmem>>, vector<1x1xf32>
      %116 = arith.mulf %115, %106 : vector<1x1xf32>
      %c0_68 = arith.constant 0 : index
      %c0_69 = arith.constant 0 : index
      %117 = vector.load %arg12[%c0_68, %c0_69] : memref<1x1xf32, #tpu.memory_space<vmem>>, vector<1x1xf32>
      tpu.vector_store %arg12[%c0_68, %c0_69], %116 {strides = array<i32>} : memref<1x1xf32, #tpu.memory_space<vmem>>, vector<1x1xf32>,
    } else {
    }
    return
  }
  func.func @transform_0(%arg0: i32, %arg1: i32, %arg2: memref<2xi32, #tpu.memory_space<smem>>) -> (i32, i32) {
    %c0_i32 = arith.constant 0 : i32
    %c0_i32_0 = arith.constant 0 : i32
    %c0_i32_1 = arith.constant 0 : i32
    return %c0_i32, %c0_i32_0 : i32, i32
  }
  func.func @transform_1(%arg0: i32, %arg1: i32, %arg2: memref<2xi32, #tpu.memory_space<smem>>) -> (i32, i32, i32) {
    %c0_i32 = arith.constant 0 : i32
    %c0_i32_0 = arith.constant 0 : i32
    return %arg0, %arg1, %c0_i32 : i32, i32, i32
  }
  func.func @transform_2(%arg0: i32, %arg1: i32, %arg2: memref<2xi32, #tpu.memory_space<smem>>) -> (i32, i32, i32) {
    %c0_i32 = arith.constant 0 : i32
    %c0_i32_0 = arith.constant 0 : i32
    return %arg0, %arg1, %c0_i32 : i32, i32, i32
  }
  func.func @transform_3(%arg0: i32, %arg1: i32, %arg2: memref<2xi32, #tpu.memory_space<smem>>) -> (i32, i32, i32) {
    %c0_i32 = arith.constant 0 : i32
    %c0_i32_0 = arith.constant 0 : i32
    return %arg0, %arg1, %c0_i32 : i32, i32, i32
  }
  func.func @transform_4(%arg0: i32, %arg1: i32, %arg2: memref<2xi32, #tpu.memory_space<smem>>) -> (i32, i32, i32) {
    %c0_i32 = arith.constant 0 : i32
    %c0_i32_0 = arith.constant 0 : i32
    return %arg0, %arg1, %c0_i32 : i32, i32, i32
  }
  func.func @transform_5(%arg0: i32, %arg1: i32, %arg2: memref<2xi32, #tpu.memory_space<smem>>) -> (i32, i32, i32) {
    %c0_i32 = arith.constant 0 : i32
    %c0_i32_0 = arith.constant 0 : i32
    return %arg0, %arg1, %c0_i32 : i32, i32, i32
  }
  func.func @transform_6(%arg0: i32, %arg1: i32, %arg2: memref<2xi32, #tpu.memory_space<smem>>) -> (i32, i32, i32) {
    %c0_i32 = arith.constant 0 : i32
    %c0_i32_0 = arith.constant 0 : i32
    return %arg0, %arg1, %c0_i32 : i32, i32, i32
  }
  func.func @transform_7(%arg0: i32, %arg1: i32, %arg2: memref<2xi32, #tpu.memory_space<smem>>) -> (i32, i32) {
    %c0_i32 = arith.constant 0 : i32
    %c0_i32_0 = arith.constant 0 : i32
    %c0_i32_1 = arith.constant 0 : i32
    return %c0_i32, %c0_i32_0 : i32, i32
  }
  func.func @transform_8(%arg0: i32, %arg1: i32, %arg2: memref<2xi32, #tpu.memory_space<smem>>) -> (i32, i32) {
    %c0_i32 = arith.constant 0 : i32
    %c0_i32_0 = arith.constant 0 : i32
    %c0_i32_1 = arith.constant 0 : i32
    return %c0_i32, %c0_i32_0 : i32, i32
  }
  func.func @transform_9(%arg0: i32, %arg1: i32, %arg2: memref<2xi32, #tpu.memory_space<smem>>) -> (i32, i32) {
    %c0_i32 = arith.constant 0 : i32
    %c0_i32_0 = arith.constant 0 : i32
    %c0_i32_1 = arith.constant 0 : i32
    return %c0_i32, %c0_i32_0 : i32, i32
  }
}

</mosaic_0001>

<bundles_post_ra>
// kernel: tpu_custom_call.1
= control target key start
LH: loop header
LB: loop body
LE: loop exit
PB: predicated region body
PF: predicated region fallthrough
CT: control target
= control target key end

     0   :  { %s1259_s0 = inlined_call_operand.vmem [shape: s32[2], index: 0, kind: input, shape index: {}]   ;;  %s1260_s1 = inlined_call_operand.vmem [shape: f32[1,2], index: 1, kind: input, shape index: {}]   ;;  %s1261_s2 = inlined_call_operand.vmem [shape: f32[2,8,1], index: 2, kind: input, shape index: {}]   ;;  %s1262_s3 = inlined_call_operand.vmem [shape: f32[2,8,1], index: 3, kind: input, shape index: {}]   ;;  %s1263_s4 = inlined_call_operand.vmem [shape: s32[2,8,1], index: 4, kind: input, shape index: {}]   ;;  %s1264_s5 = inlined_call_operand.vmem [shape: f32[2,8,8], index: 5, kind: input, shape index: {}]   ;;  %s1265_s6 = inlined_call_operand.vmem [shape: f32[2,8,16], index: 6, kind: input, shape index: {}]   ;;  %s1266_s7 = inlined_call_operand.vmem [shape: f32[2,8,16], index: 7, kind: input, shape index: {}]   ;;  %s1267_s8 = inlined_call_operand.hbm [shape: f32[1,1], index: 8, kind: output, shape index: {0}]   ;;  %s1268_s9 = inlined_call_operand.hbm [shape: f32[1,1], index: 9, kind: output, shape index: {1}]   ;;  %s1269_s10 = inlined_call_operand.hbm [shape: f32[1,1], index: 10, kind: output, shape index: {2}]  }
   0x1   :  { %s16_s15 = sshll.u32 %s1259_s0, 4  ;;  %s17_s15 = int_to_ptr.vmem [resolvable:$true] %s16_s15 }
   0x2   :  { %s891_s16 = scalar_lea.vmem %s17_s15, 16  ;;  %p896_p1 = scmp.lt.s32.totalorder %s17_s15, %s17_s15 }
   0x3   :  { %p892_p0 = scmp.ne.s32.totalorder %s17_s15, %s891_s16  ;;  %p897_p2 = scmp.lt.s32.totalorder %s891_s16, %s891_s16 }
   0x5   :  { %p898_p3 = por %p897_p2, %p896_p1 }
   0x7   :  { %p899_p4 = pnand %p898_p3, %p892_p0 }
   0x9   :  { %902 = shalt.err (!%p899_p4)  }
   0xa   :  { %s1015_s17 = smov [#allocation7]  }
   0xb   :  { %19 = dma.vmem_to_smem %s17_s15, 16, %s1015_s17, [#allocation6] }
   0xc   :  { %993 = dma.done.wait [#allocation6], 16 }
   0xd   :  { %994 = vsyncadd [#allocation6], 4294967280 }
   0xe   :  { %21 = sfence }
   0xf   :  { %22 = vsyncpa [#allocation9], 0 }
  0x10   :  { %23 = vsyncpa [#allocation11], 0  ;;  %s1081_s18 = smov 0   ;;  %s1083_s19 = smov 0  }
  0x11   :  { %s1085_s0 = smov 0  }
  0x12 LB: > { %s41_s21 = sadd.s32 1, %s1009_s19  ;;  %p810_p6 = scmp.ge.s32.totalorder %s1013_s0, 1  ;;  %s1013_s0 = sphi %s1085_s0, %s29_s0   ;;  %s1009_s19 = sphi %s1083_s19, %s1275_s19   ;;  %s1005_s18 = sphi %s1081_s18, %s1274_s18  }
  0x13   : > { %p43_p5 = scmp.ge.s32.totalorder %s41_s21, 2  ;;  %p372_p7 = scmp.lt.s32.totalorder %s1013_s0, 3 }
  0x15   : > { %s1277_s21 = smov (%p43_p5, %s41_s21), 0  ;;  %p373_p8 = pnand %p810_p6, %p372_p7 }
  0x16   : > { %p440_p9 = scmp.lt.s32.totalorder (!%p373_p8), %s1005_s18, 1  ;;  %p482_p10 = scmp.eq.s32.totalorder (!%p373_p8), %s1005_s18, 0 }
  0x17   : > { %376 = sbr.rel (%p373_p8) target bundleno = 420 (0x1a4), region = 48  ;;  %p486_p11 = scmp.eq.s32.totalorder (!%p373_p8), %s1005_s18, 1 }
  0x1e   : > { %s441_s22 = scalar_select %p440_p9, %s1005_s18, 1 }
  0x1f   : > { %490 = sbr.rel (!%p482_p10) target bundleno = 38 (0x26), region = 52  ;;  %vm491_vm0 = vcmask (%p482_p10), 0   ;;  %v1016_v0 = vmov (%p482_p10), 0.0  }
  0x20   : > { %s1106_s23 = sshll.u32 %s441_s22, 3  ;;  %492 = vst.msk [vmem:[#allocation2] sm:$0x1] (%p482_p10), %vm491_vm0, %v1016_v0  ;;  %493 = vst.msk [vmem:[#allocation3] sm:$0x1] (%p482_p10), %vm491_vm0, %v1016_v0 }
  0x21   : > { %s446_s26 = scalar_lea.vmem %s1261_s2, %s1106_s23  ;;  %s453_s29 = scalar_lea.vmem %s1262_s3, %s1106_s23  ;;  %494 = vst.msk [vmem:[#allocation4] sm:$0x1] (%p482_p10), %vm491_vm0, %v1016_v0  ;;  %495 = vst.msk [vmem:[#allocation5] sm:$0x1] (%p482_p10), %vm491_vm0, %v1016_v0 }
  0x22   : > { %s460_s12 = scalar_lea.vmem %s1263_s4, %s1106_s23  ;;  %s467_s15 = scalar_lea.vmem %s1264_s5, %s1106_s23 }
  0x23   : > { %s474_s22 = scalar_lea.vmem %s1265_s6, %s1106_s23  ;;  %s481_s20 = scalar_lea.vmem %s1266_s7, %s1106_s23 }
  0x26 PF: > { %v553_v1 = vld [vmem:[%s460_s12] sm:$0xff]  ;;  %s496_s27 = sld [smem:[#allocation7 + %s1005_s18]]  ;;  %v498_v2 = vlaneseq  ;;  %v1017_v3 = vmov 0   ;;  %v1018_v10 = vmov 0.0   ;;  %s1019_s11 = smov 127   ;;  %vm550_vm4 = vcmask 0  }
  0x27   : > { %880 = vset.pattern.permute.xlu0 %v1017_v3  ;;  %v506_v4 = vld [vmem:[%s1260_s1] sm:$0x1]  ;;  %vm554_vm1 = vcmp.ne.s32.totalorder %v553_v1, 4294967196  ;;  %vm591_vm5 = vcmask 130048   ;;  %vm569_vm8 = vcmask 64512   ;;  %vm541_vm10 = vcmask 7168  }
  0x28   : > { %559 = vperm.xlu0 %880, %v553_v1   ;;  %v499_v5 = vshrl.u32 %v498_v2, 7  ;;  %881 = vrcp.f32 %v506_v4  ;;  %v584_v18 = vld [vmem:[%s481_s20] sm:$0xff]  ;;  %v557_v44 = vand.u32 127, %v498_v2 }
  0x29   : > { %v588_v20 = vmul.f32 1.442695, %v584_v18  ;;  %v583_v23 = vld [vmem:[%s474_s22] sm:$0xff]  ;;  %v585_v25 = vadd.f32 1.0, %v584_v18 }
  0x2a   : > { %v514_v6 = vsub.s32 0, %v499_v5  ;;  %v606_v24 = vld [vmem:[#allocation5] sm:$0x1]  ;;  %v586_v26 = vmul.f32 %v583_v23, %v583_v23  ;;  %v540_v61 = vld [vmem:[#allocation2] sm:$0x1] }
  0x2b   : > { %883 = vpow2.f32 %v588_v20  ;;  %v510_v32 = vld [vmem:[%s453_s29] sm:$0xff] }
  0x2c   : > { %v502_v7 = vstv %s496_s27  ;;  %v515_v8 = vrot.slane %v506_v4, %v514_v6  ;;  %v587_v28 = vsub.f32 %v585_v25, %v586_v26  ;;  %v509_v34 = vld [vmem:[%s446_s26] sm:$0xff] }
  0x2d   : > { %vm1136_vm2 = vcmp.lt.s32.totalorder %v499_v5, %v502_v7  ;;  %v552_v46 = vld [vmem:[%s467_s15] sm:$0xff] }
  0x2e   : > { %v819_v11 = vsel %vm1136_vm2, 1.0, %v1018_v10  ;;  %vm555_vm3 = vmand %vm1136_vm2, %vm554_vm1  ;;  %519 = vrot.lane.b32.xlu1 %v515_v8, %s1019_s11  ;;  %v517_v33 = vmul.f32 %v515_v8, %v510_v32  ;;  %v597_v8 = vld [vmem:[#allocation4] sm:$0x1] }
  0x2f   : > { %v607_v12 = vrot.slane %v819_v11, 4  ;;  %v562_v13 = vsel %vm555_vm3, 1, %v1017_v3 }
  0x30   : > { %564 = vperm.xlu0 %880, %v562_v13   ;;  %v518_v35 = vadd.f32 %v517_v33, %v509_v34 }
  0x31   : > { %v608_v14 = vadd.f32 %v819_v11, %v607_v12 }
  0x32   : > { %v882_v15 = vpop.eup %881 }
  0x33   : > { %v535_v16 = vrot.slane %v882_v15, %v514_v6  ;;  %v609_v17 = vrot.slane %v608_v14, 2 }
  0x35   : > { %v610_v19 = vadd.f32 %v609_v17, %v608_v14  ;;  %v884_v29 = vpop.eup %883 }
  0x36   : > { %v590_v30 = vsub.f32 %v587_v28, %v884_v29 }
  0x37   : > { %v611_v21 = vrot.slane %v610_v19, 1 }
  0x38   : > { %v592_v31 = vsel %vm591_vm5, %v590_v30, 0.0 }
  0x39   : > { %v612_v22 = vadd.f32 %v611_v21, %v610_v19  ;;  %v573_v19 = vld [vmem:[#allocation3] sm:$0x1] }
  0x3b   : > { %v613_v27 = vadd.f32 %v612_v22, %v606_v24 }
  0x3d   : > { %614 = vst.msk [vmem:[#allocation5] sm:$0x1] %vm550_vm4, %v613_v27 }
  0x44   : > { %v617_v21 = vld [vmem:[#allocation5] sm:$0x1] (%p486_p11) }
  0x45   : > { %v618_v22 = vmax.f32 (%p486_p11), %v617_v21, 1.0 }
  0x52   : > { %593 = vadd.xlane.f32.xlu1 %v592_v31 }
  0xa0   : > { %v520_v36 = vpop.permute.xlu1 %519 }
  0xa1   : > { %v522_v37 = vadd.f32 %v520_v36, %v518_v35  ;;  %v523_v38 = vadd.f32 %v520_v36, %v509_v34 }
  0xa3   : > { %v524_v39 = vmin.f32 %v522_v37, 10.0  ;;  %v527_v40 = vmin.f32 %v523_v38, 10.0 }
  0xa5   : > { %v525_v41 = vmul.f32 1.442695, %v524_v39  ;;  %v528_v42 = vmul.f32 1.442695, %v527_v40 }
  0xa7   : > { %885 = vpow2.f32 %v525_v41  ;;  %v560_v43 = vpop.permute.xlu0 %559 }
  0xa8   : > { %887 = vpow2.f32 %v528_v42  ;;  %vm561_vm6 = vcmp.eq.s32.totalorder %v557_v44, %v560_v43 }
  0xa9   : > { %889 = vrcp.f32 (%p486_p11), %v618_v22 }
  0xaf   : > { %v565_v45 = vpop.permute.xlu0 %564 }
  0xb0   : > { %vm566_vm7 = vcmp.eq.s32.totalorder %v565_v45, 1 }
  0xb1   : > { %v886_v47 = vpop.eup %885  ;;  %vm567_vm9 = vmand %vm561_vm6, %vm566_vm7 }
  0xb2   : > { %v888_v48 = vpop.eup %887  ;;  %v568_v49 = vsel %vm567_vm9, %v552_v46, 0.0 }
  0xb3   : > { %v570_v50 = vsel %vm569_vm8, %v568_v49, 0.0  ;;  %v530_v51 = vsub.f32 %v886_v47, %v888_v48  ;;  %v890_v27 = vpop.eup (%p486_p11), %889 }
  0xb4   : > { %571 = vadd.xlane.f32.xlu0 %v570_v50 }
  0xb5   : > { %v537_v52 = vmul.f32 %v535_v16, %v530_v51 }
  0xb7   : > { %v538_v53 = vsub.f32 %v522_v37, %v537_v52 }
  0xb9   : > { %v539_v54 = vsel %vm1136_vm2, %v538_v53, 0.0 }
  0xba   : > { %v542_v55 = vsel %vm541_vm10, %v539_v54, 0.0 }
  0xbb   : > { %v543_v56 = vrot.slane %v542_v55, 4 }
  0xbd   : > { %v544_v57 = vadd.f32 %v543_v56, %v542_v55 }
  0xbf   : > { %v545_v58 = vrot.slane %v544_v57, 2 }
  0xc1   : > { %v546_v59 = vadd.f32 %v545_v58, %v544_v57 }
  0xc3   : > { %v547_v60 = vrot.slane %v546_v59, 1 }
  0xc5   : > { %v548_v62 = vadd.f32 %v547_v60, %v546_v59 }
  0xc7   : > { %v549_v63 = vadd.f32 %v548_v62, %v540_v61 }
  0xc9   : > { %551 = vst.msk [vmem:[#allocation2] sm:$0x1] %vm550_vm4, %v549_v63 }
  0xd0   : > { %v621_v23 = vld [vmem:[#allocation2] sm:$0x1] (%p486_p11) }
  0xd1   : > { %v622_v24 = vsub.f32 (%p486_p11), 0.0, %v621_v23 }
  0xd3   : > { %v623_v28 = vmul.f32 (%p486_p11), %v890_v27, %v622_v24 }
  0xd5   : > { %624 = vst.msk [vmem:[#allocation8] sm:$0x1] (%p486_p11), %vm550_vm4, %v623_v28 }
  0xdf   : > { %v594_v0 = vpop.xlane.xlu1 %593 }
  0xe0   : > { %v595_v1 = vmul.f32 -0.5, %v594_v0 }
  0xe2   : > { %v596_v2 = vsel %vm1136_vm2, %v595_v1, 0.0 }
  0xe3   : > { %v598_v3 = vrot.slane %v596_v2, 4 }
  0xe5   : > { %v599_v4 = vadd.f32 %v598_v3, %v596_v2 }
  0xe7   : > { %v600_v5 = vrot.slane %v599_v4, 2 }
  0xe9   : > { %v601_v6 = vadd.f32 %v600_v5, %v599_v4 }
  0xeb   : > { %v602_v7 = vrot.slane %v601_v6, 1 }
  0xed   : > { %v603_v10 = vadd.f32 %v602_v7, %v601_v6 }
  0xef   : > { %v604_v11 = vadd.f32 %v603_v10, %v597_v8 }
  0xf1   : > { %605 = vst.msk [vmem:[#allocation4] sm:$0x1] %vm550_vm4, %v604_v11 }
  0xf8   : > { %v628_v26 = vld [vmem:[#allocation4] sm:$0x1] (%p486_p11) }
  0xf9   : > { %v629_v30 = vmul.f32 (%p486_p11), %v890_v27, %v628_v26 }
  0xfb   : > { %630 = vst.msk [vmem:[#allocation12] sm:$0x1] (%p486_p11), %vm550_vm4, %v629_v30 }
 0x141   : > { %v572_v12 = vpop.xlane.xlu0 %571 }
 0x142   : > { %v574_v13 = vrot.slane %v572_v12, 4 }
 0x144   : > { %v575_v14 = vadd.f32 %v574_v13, %v572_v12 }
 0x146   : > { %v576_v15 = vrot.slane %v575_v14, 2 }
 0x148   : > { %v577_v16 = vadd.f32 %v576_v15, %v575_v14 }
 0x14a   : > { %v578_v17 = vrot.slane %v577_v16, 1 }
 0x14c   : > { %v579_v18 = vadd.f32 %v578_v17, %v577_v16  ;;  %616 = sbr.rel (!%p486_p11) target bundleno = 349 (0x15d), region = 56 }
 0x14e   : > { %v580_v9 = vsub.f32 0.0, %v579_v18 }
 0x150   : > { %v581_v20 = vadd.f32 %v580_v9, %v573_v19 }
 0x152   : > { %582 = vst.msk [vmem:[#allocation3] sm:$0x1] %vm550_vm4, %v581_v20 }
 0x159   : > { %v625_v25 = vld [vmem:[#allocation3] sm:$0x1] }
 0x15a   : > { %v626_v29 = vmul.f32 %v890_v27, %v625_v25 }
 0x15c   : > { %627 = vst.msk [vmem:[#allocation10] sm:$0x1] %vm550_vm4, %v626_v29 }
 0x15d PF: > { %s1272_s18 = sadd.s32 4294967295, %s1013_s0   ;;  %s1020_s26 = smov [#allocation10]  }
 0x15e   : > { %p1184_p12 = scmp.eq.s32.totalorder %s1272_s18, 1  ;;  %s649_s15 = sshll.u32 %s1020_s26, 4  ;;  %s650_s15 = int_to_ptr.vmem [resolvable:$true] %s649_s15 }
 0x15f   : > { %s903_s27 = scalar_lea.vmem %s650_s15, 16  ;;  %s909_s28 = scalar_lea.vmem %s650_s15, 32 }
 0x160   : > { %p904_p13 = scmp.ne.s32.totalorder %s650_s15, %s903_s27  ;;  %p910_p2 = scmp.lt.s32.totalorder %s650_s15, %s650_s15 }
 0x161   : > { %p911_p3 = scmp.lt.s32.totalorder %s909_s28, %s903_s27 }
 0x162   : > { %p905_p0 = pnand %p904_p13, %p1184_p12 }
 0x163   : > { %p912_p4 = por %p911_p3, %p910_p2 }
 0x164   : > { %p906_p1 = pneg %p905_p0 }
 0x166   : > { %p913_p5 = pnand %p912_p4, %p906_p1 }
 0x168   : > { %916 = shalt.err (!%p913_p5)
}
 0x169   : > { %s917_s12 = scalar_lea.hbm %s1268_s9, 16 }
 0x16a   : > { %p918_p6 = scmp.ne.s32.totalorder %s1268_s9, %s917_s12  ;;  %p923_p9 = scmp.lt.u32.totalorder %s917_s12, %s1268_s9 }
 0x16c   : > { %p919_p7 = pnand %p918_p6, %p1184_p12 }
 0x16e   : > { %p920_p8 = pneg %p919_p7 }
 0x170   : > { %p925_p10 = pnand %p923_p9, %p920_p8 }
 0x172   : > { %928 = shalt.err (!%p925_p10)
}
 0x173   : > { %833 = dma.vmem_to_hbm [thread:$0]  (%p1184_p12), %s650_s15, 16, %s1268_s9, [#allocation11]  }
 0x174   : > { %s1021_s24 = smov [#allocation8]   ;;  %s1022_s25 = smov [#allocation12]  }
 0x175   : > { %s638_s29 = sshll.u32 %s1021_s24, 4  ;;  %s660_s18 = sshll.u32 %s1022_s25, 4  ;;  %s639_s29 = int_to_ptr.vmem [resolvable:$true] %s638_s29  ;;  %s661_s18 = int_to_ptr.vmem [resolvable:$true] %s660_s18 }
 0x176   : > { %s929_s26 = scalar_lea.vmem %s639_s29, 16  ;;  %s935_s27 = scalar_lea.vmem %s639_s29, 32 }
 0x177   : > { %p930_p11 = scmp.ne.s32.totalorder %s639_s29, %s929_s26  ;;  %p936_p1 = scmp.lt.s32.totalorder %s639_s29, %s639_s29 }
 0x178   : > { %p937_p2 = scmp.lt.s32.totalorder %s935_s27, %s929_s26 }
 0x179   : > { %p931_p13 = pnand %p930_p11, %p1184_p12 }
 0x17a   : > { %p938_p3 = por %p937_p2, %p936_p1 }
 0x17b   : > { %p932_p0 = pneg %p931_p13 }
 0x17d   : > { %p939_p4 = pnand %p938_p3, %p932_p0 }
 0x17f   : > { %942 = shalt.err (!%p939_p4)
}
 0x180   : > { %s943_s15 = scalar_lea.hbm %s1267_s8, 16 }
 0x181   : > { %p944_p5 = scmp.ne.s32.totalorder %s1267_s8, %s943_s15  ;;  %p949_p8 = scmp.lt.u32.totalorder %s943_s15, %s1267_s8 }
 0x183   : > { %p945_p6 = pnand %p944_p5, %p1184_p12 }
 0x185   : > { %p946_p7 = pneg %p945_p6 }
 0x187   : > { %p951_p9 = pnand %p949_p8, %p946_p7 }
 0x189   : > { %954 = shalt.err (!%p951_p9)
}
 0x18a   : > { %831 = dma.vmem_to_hbm [thread:$0]  (%p1184_p12), %s639_s29, 16, %s1267_s8, [#allocation9]  }
 0x18b   : > { %s955_s17 = scalar_lea.vmem %s661_s18, 16  ;;  %s961_s22 = scalar_lea.vmem %s661_s18, 32 }
 0x18c   : > { %p956_p10 = scmp.ne.s32.totalorder %s661_s18, %s955_s17  ;;  %p962_p0 = scmp.lt.s32.totalorder %s661_s18, %s661_s18 }
 0x18d   : > { %p963_p1 = scmp.lt.s32.totalorder %s961_s22, %s955_s17 }
 0x18e   : > { %p957_p11 = pnand %p956_p10, %p1184_p12 }
 0x18f   : > { %p964_p2 = por %p963_p1, %p962_p0 }
 0x190   : > { %p958_p13 = pneg %p957_p11 }
 0x192   : > { %p965_p3 = pnand %p964_p2, %p958_p13 }
 0x194   : > { %968 = shalt.err (!%p965_p3)
}
 0x195   : > { %s969_s26 = scalar_lea.hbm %s1269_s10, 16 }
 0x196   : > { %p970_p4 = scmp.ne.s32.totalorder %s1269_s10, %s969_s26  ;;  %p975_p7 = scmp.lt.u32.totalorder %s969_s26, %s1269_s10 }
 0x198   : > { %p971_p5 = pnand %p970_p4, %p1184_p12 }
 0x19a   : > { %p972_p6 = pneg %p971_p5 }
 0x19c   : > { %p977_p8 = pnand %p975_p7, %p972_p6 }
 0x19e   : > { %980 = shalt.err (!%p977_p8)
}
 0x19f   : > { %835 = dma.vmem_to_hbm [thread:$0]  (%p1184_p12), %s661_s18, 16, %s1269_s10, [#allocation11]  }
 0x1a0   : > { %996 = dma.done.wait (%p1184_p12), [#allocation9], 16  }
 0x1a1   : > { %998 = vsyncadd (%p1184_p12), [#allocation9], 4294967280 }
 0x1a2   : > { %1000 = dma.done.wait (%p1184_p12), [#allocation11], 32  }
 0x1a3   : > { %1002 = vsyncadd (%p1184_p12), [#allocation11], 4294967264 }
 0x1a4 PF: > { %s29_s0 = sadd.s32 1, %s1013_s0   ;;  %s1274_s18 = smov %s1009_s19 }
 0x1a5   : > { %p26_p9 = scmp.ge.s32.totalorder %s29_s0, 4   ;;  %s1275_s19 = smov %s1277_s21 }
 0x1a7   :  { %28 = sbr.rel (!%p26_p9) target bundleno = 18 (0x12), region = 114 }
 0x1ae   :  { %681 = vsyncpa [#allocation9], 1 }
 0x1af   :  { %683 = vsyncpa [#allocation9 + $0x1], 1 }
 0x1b0   :  { %684 = vsyncpa [#allocation11], 1 }

</bundles_post_ra>
